<compile_context>
chip_gen: v6e
topology: v6e:2x2x1
jax: 0.10.0
libtpu: 0.0.40
codegen_flags: <defaults>
</compile_context>

<pallas_src>
import math

import jax
import jax.numpy as jnp
from jax.experimental import pallas as pl
from jax.experimental.pallas import tpu as pltpu

_SHIFT = math.log(2.0)
_LANES = 128
_SUBLANES = 8
_TARGET_BLOCK_BYTES = 4 * 1024 * 1024   # ~4 MiB per block buffer
_MIN_TILE_ROWS = 512                    # ~256 KiB at f32: keep DMAs efficient
_VMEM_LIMIT_BYTES = 32 * 1024 * 1024    # explicit: safe on v5e/v6e/v7x


def _shifted_softplus_kernel(x_ref, o_ref):
    xf = x_ref[...].astype(jnp.float32)
    # Numerically stable softplus: max(x, 0) + log1p(exp(-|x|)).
    # Matches torch.nn.functional.softplus (incl. its >20 linearization)
    # to f32 precision without an extra select.
    sp = jnp.maximum(xf, 0.0) + jnp.log1p(jnp.exp(-jnp.abs(xf)))
    o_ref[...] = (sp - _SHIFT).astype(o_ref.dtype)


def _shifted_softplus_jnp(x: jax.Array) -> jax.Array:
    # Plain-JAX path for the tiny (<128 element) ragged tail.
    xf = x.astype(jnp.float32)
    sp = jnp.maximum(xf, 0.0) + jnp.log1p(jnp.exp(-jnp.abs(xf)))
    return (sp - _SHIFT).astype(x.dtype)


def _sublane_multiple(itemsize: int) -> int:
    # Packed dtypes need tile_rows aligned to their native sublane packing:
    # f32 -> 8, bf16 -> 16, int8/fp8 -> 32.
    return max(_SUBLANES, 32 // itemsize)


def _pick_tile_rows(rows: int, itemsize: int) -> int:
    mult = _sublane_multiple(itemsize)

    # ~4 MiB per block buffer (double-buffered in + out = ~16 MiB total,
    # under the explicit 32 MiB scoped-VMEM limit on every generation).
    target = _TARGET_BLOCK_BYTES // (_LANES * itemsize)
    target = max(mult, (target // mult) * mult)

    # Guarantee >= ~4 grid blocks for medium tensors so v7x can shard the
    # "parallel" axis across both TensorCores and the pipeline overlaps,
    # but never drop below ~512 rows per block.
    cap = pl.cdiv(rows, 4)
    cap = ((cap + mult - 1) // mult) * mult
    cap = max(cap, _MIN_TILE_ROWS)

    tile = min(target, cap)
    if tile >= rows:
        return rows  # single full-extent block (always layout-legal)
    return tile      # multiple of `mult`; cdiv grid masks the partial last block


def _run_kernel_2d(x2d: jax.Array) -> jax.Array:
    rows, lanes = x2d.shape
    itemsize = jnp.dtype(x2d.dtype).itemsize
    tile_rows = _pick_tile_rows(rows, itemsize)
    grid = (pl.cdiv(rows, tile_rows),)

    n = rows * lanes
    cost = pl.CostEstimate(
        flops=5 * n,              # max, abs, neg, add, sub
        transcendentals=2 * n,    # exp + log1p
        bytes_accessed=2 * n * itemsize,
    )

    return pl.pallas_call(
        _shifted_softplus_kernel,
        out_shape=jax.ShapeDtypeStruct((rows, lanes), x2d.dtype),
        grid_spec=pltpu.PrefetchScalarGridSpec(
            num_scalar_prefetch=0,
            grid=grid,
            in_specs=[pl.BlockSpec((tile_rows, lanes), lambda i: (i, 0))],
            out_specs=pl.BlockSpec((tile_rows, lanes), lambda i: (i, 0)),
        ),
        compiler_params=pltpu.CompilerParams(
            dimension_semantics=("parallel",),
            vmem_limit_bytes=_VMEM_LIMIT_BYTES,
        ),
        cost_estimate=cost,
    )(x2d)


def shifted_softplus(x: jax.Array) -> jax.Array:
    """ShiftedSoftplus forward, elementwise, any shape (float dtypes)."""
    orig_shape = x.shape
    n = x.size
    if n == 0:
        return x

    x_flat = x.reshape(-1)  # contiguous flatten: layout no-op
    n_tail = n % _LANES

    if n_tail == 0:
        # Fast path: reshape-only wrapper, exactly 1 HBM read + 1 write.
        out2d = _run_kernel_2d(x_flat.reshape(n // _LANES, _LANES))
        return out2d.reshape(orig_shape)

    # Ragged path: largest 128-aligned prefix through the kernel, the
    # <=127-element tail with plain jnp.  No whole-tensor pad/slice copies.
    n_bulk = n - n_tail
    tail_out = _shifted_softplus_jnp(x_flat[n_bulk:])
    if n_bulk == 0:
        return tail_out.reshape(orig_shape)
    bulk_out = _run_kernel_2d(x_flat[:n_bulk].reshape(n_bulk // _LANES, _LANES))
    out = jnp.concatenate([bulk_out.reshape(-1), tail_out])
    return out.reshape(orig_shape)


def _reference(x):
    xf = x.astype(jnp.float32)
    return (jnp.logaddexp(xf, 0.0) - _SHIFT).astype(x.dtype)


if __name__ == "__main__":
    key = jax.random.PRNGKey(0)
    k1, k2, k3 = jax.random.split(key, 3)

    # NCHW-style input consistent with typical usage inside SchNet blocks.
    x = jax.random.normal(k1, (2, 4, 16, 16), dtype=jnp.float32) * 5.0
    y = jax.block_until_ready(shifted_softplus(x))
    assert y.shape == x.shape and y.dtype == x.dtype
    assert jnp.allclose(y, _reference(x), atol=1e-5, rtol=1e-5)

    # Ragged size: exercises bulk-prefix kernel + jnp tail (no pad/slice pass).
    x2 = jax.random.normal(k2, (3, 5, 17), dtype=jnp.float32) * 5.0  # 255 elems
    y2 = jax.block_until_ready(shifted_softplus(x2))
    assert y2.shape == x2.shape and y2.dtype == x2.dtype
    assert jnp.allclose(y2, _reference(x2), atol=1e-5, rtol=1e-5)

    # bf16 input: dtype-aware sublane alignment, f32 internal compute.
    x3 = (jax.random.normal(k3, (8, 128), dtype=jnp.float32) * 5.0).astype(
        jnp.bfloat16)
    y3 = jax.block_until_ready(shifted_softplus(x3))
    assert y3.shape == x3.shape and y3.dtype == x3.dtype
    assert jnp.allclose(y3.astype(jnp.float32),
                        _reference(x3).astype(jnp.float32),
                        atol=2e-2, rtol=2e-2)

    print("KERNEL_OK")
</pallas_src>

<mosaic_0001>
module attributes {stable_mosaic.version = 11 : i64} {
  func.func @_shifted_softplus_kernel(%arg0: i32, %arg1: memref<16x128xf32, #tpu.memory_space<vmem>>, %arg2: memref<16x128xf32, #tpu.memory_space<vmem>>) attributes {dimension_semantics = [#tpu.dimension_semantics<parallel>], iteration_bounds = array<i64: 1>, scalar_prefetch = 0 : i64, scratch_operands = 0 : i64, tpu.core_type = #tpu.core_type<tc>, window_params = [{transform_indices = @transform_0, window_bounds = array<i64: 16, 128>}, {transform_indices = @transform_1, window_bounds = array<i64: 16, 128>}]} {
    %c0 = arith.constant 0 : index
    %c0_0 = arith.constant 0 : index
    %0 = vector.load %arg1[%c0, %c0_0] : memref<16x128xf32, #tpu.memory_space<vmem>>, vector<16x128xf32>
    %cst = arith.constant 0.000000e+00 : f32
    %1 = vector.broadcast %cst : f32 to vector<16x128xf32>
    %2 = arith.maximumf %0, %1 : vector<16x128xf32>
    %3 = math.absf %0 : vector<16x128xf32>
    %cst_1 = arith.constant 0.000000e+00 : f32
    %4 = vector.broadcast %cst_1 : f32 to vector<16x128xf32>
    %5 = arith.subf %4, %3 : vector<16x128xf32>
    %6 = math.exp %5 : vector<16x128xf32>
    %7 = math.log1p %6 : vector<16x128xf32>
    %8 = arith.addf %2, %7 : vector<16x128xf32>
    %cst_2 = arith.constant 0.693147182 : f32
    %9 = vector.broadcast %cst_2 : f32 to vector<16x128xf32>
    %10 = arith.subf %8, %9 : vector<16x128xf32>
    %c0_3 = arith.constant 0 : index
    %c0_4 = arith.constant 0 : index
    %11 = vector.load %arg2[%c0_3, %c0_4] : memref<16x128xf32, #tpu.memory_space<vmem>>, vector<16x128xf32>
    tpu.vector_store %arg2[%c0_3, %c0_4], %10 {strides = array<i32>} : memref<16x128xf32, #tpu.memory_space<vmem>>, vector<16x128xf32>,
    return
  }
  func.func @transform_0(%arg0: i32) -> (i32, i32) {
    %c0_i32 = arith.constant 0 : i32
    %c0_i32_0 = arith.constant 0 : i32
    return %arg0, %c0_i32 : i32, i32
  }
  func.func @transform_1(%arg0: i32) -> (i32, i32) {
    %c0_i32 = arith.constant 0 : i32
    %c0_i32_0 = arith.constant 0 : i32
    return %arg0, %c0_i32 : i32, i32
  }
}

</mosaic_0001>

<bundles_post_ra>
// kernel: tpu_custom_call.1
= control target key start
LH: loop header
LB: loop body
LE: loop exit
PB: predicated region body
PF: predicated region fallthrough
CT: control target
= control target key end

     0   :  { %6 = vsyncpa [#allocation3], 0  ;;  %s160_s0 = inlined_call_operand.hbm [shape: f32[16,128], index: 0, kind: input, shape index: {}]   ;;  %s161_s1 = inlined_call_operand.hbm [shape: f32[16,128], index: 1, kind: output, shape index: {}]  }
   0x1   :  { %7 = vsyncpa [#allocation4], 0  ;;  %s134_s6 = smov [#allocation2]  }
   0x2   :  { %s13_s7 = sshll.u32 %s134_s6, 4  ;;  %s14_s7 = int_to_ptr.vmem [resolvable:$true] %s13_s7 }
   0x3   :  { %s98_s8 = scalar_lea.vmem %s14_s7, 256  ;;  %p103_p1 = scmp.lt.s32.totalorder %s14_s7, %s14_s7 }
   0x4   :  { %p99_p0 = scmp.ne.s32.totalorder %s14_s7, %s98_s8  ;;  %p104_p2 = scmp.lt.s32.totalorder %s98_s8, %s98_s8 }
   0x6   :  { %p105_p3 = por %p104_p2, %p103_p1 }
   0x8   :  { %p106_p4 = pnand %p105_p3, %p99_p0 }
   0xa   :  { %109 = shalt.err (!%p106_p4)
}
   0xb   :  { %s135_s9 = smov 128   ;;  %s136_s10 = smov 8  }
   0xc   :  { %19 = dma.hbm_to_vmem [thread:$0]  %s160_s0, 256, %s14_s7, [#allocation3], %s135_s9, %s135_s9, %s136_s10  }
   0xd   :  { %130 = dma.done.wait [#allocation3], 256  }
   0xe   :  { %131 = vsyncadd [#allocation3], 4294967040  ;;  %v23_v0 = vld [vmem:[#allocation2] sm:$0xff]  ;;  %v24_v1 = vld [vmem:[#allocation2 + $0x8] sm:$0xff]  ;;  %s137_s0 = smov [#allocation5]  }
   0xf   :  { %v27_v2 = vand.u32 2147483647, %v23_v0  ;;  %v28_v3 = vand.u32 2147483647, %v24_v1  ;;  %v25_v20 = vmax.f32 %v23_v0, 0.0  ;;  %v26_v24 = vmax.f32 %v24_v1, 0.0 }
  0x10   :  { %s64_s13 = sshll.u32 %s137_s0, 4  ;;  %s65_s13 = int_to_ptr.vmem [resolvable:$true] %s64_s13 }
  0x11   :  { %v29_v4 = vsub.f32 0.0, %v27_v2  ;;  %v30_v5 = vsub.f32 0.0, %v28_v3  ;;  %s110_s14 = scalar_lea.vmem %s65_s13, 256  ;;  %p115_p6 = scmp.lt.s32.totalorder %s65_s13, %s65_s13 }
  0x12   :  { %p111_p5 = scmp.ne.s32.totalorder %s65_s13, %s110_s14  ;;  %p116_p7 = scmp.lt.s32.totalorder %s110_s14, %s110_s14 }
  0x13   :  { %v31_v6 = vmul.f32 1.442695, %v29_v4  ;;  %v33_v7 = vmul.f32 1.442695, %v30_v5 }
  0x14   :  { %p117_p8 = por %p116_p7, %p115_p6 }
  0x15   :  { %82 = vpow2.f32 %v31_v6 }
  0x16   :  { %84 = vpow2.f32 %v33_v7  ;;  %p118_p9 = pnand %p117_p8, %p111_p5 }
  0x22   :  { %v83_v8 = vpop.eup %82 }
  0x23   :  { %v85_v9 = vpop.eup %84  ;;  %v35_v10 = vadd.f32 1.0, %v83_v8  ;;  %v38_v12 = vmul.f32 -0.5, %v83_v8  ;;  %v41_v15 = vand.u32 2147483647, %v83_v8 }
  0x24   :  { %v44_v11 = vadd.f32 1.0, %v85_v9  ;;  %v47_v13 = vmul.f32 -0.5, %v85_v9  ;;  %v50_v17 = vand.u32 2147483647, %v85_v9 }
  0x25   :  { %86 = vlog2.f32 %v35_v10  ;;  %v39_v14 = vadd.f32 1.0, %v38_v12  ;;  %vm42_vm0 = vcmp.lt.f32.partialorder %v41_v15, 0.0004427343 }
  0x26   :  { %88 = vlog2.f32 %v44_v11  ;;  %v48_v16 = vadd.f32 1.0, %v47_v13  ;;  %vm51_vm1 = vcmp.lt.f32.partialorder %v50_v17, 0.0004427343 }
  0x27   :  { %v40_v18 = vmul.f32 %v83_v8, %v39_v14 }
  0x28   :  { %v49_v21 = vmul.f32 %v85_v9, %v48_v16 }
  0x32   :  { %v87_v19 = vpop.eup %86 }
  0x33   :  { %v89_v22 = vpop.eup %88  ;;  %v37_v23 = vmul.f32 0.6931472, %v87_v19 }
  0x34   :  { %v46_v25 = vmul.f32 0.6931472, %v89_v22 }
  0x35   :  { %v43_v26 = vsel %vm42_vm0, %v40_v18, %v37_v23 }
  0x36   :  { %v53_v27 = vadd.f32 %v43_v26, %v25_v20  ;;  %v52_v28 = vsel %vm51_vm1, %v49_v21, %v46_v25 }
  0x37   :  { %v54_v29 = vadd.f32 %v52_v28, %v26_v24 }
  0x38   :  { %v76_v30 = vadd.f32 -0.6931472, %v53_v27 }
  0x39   :  { %v77_v31 = vadd.f32 -0.6931472, %v54_v29 }
  0x3a   :  { %57 = vst [vmem:[#allocation5] sm:$0xff] %v76_v30 }
  0x3b   :  { %58 = vst [vmem:[#allocation5 + $0x8] sm:$0xff] %v77_v31 }
  0x3c   :  { %121 = shalt.err (!%p118_p9)
}
  0x3d   :  { %70 = dma.vmem_to_hbm [thread:$0]  %s65_s13, 256, %s161_s1, [#allocation4], %s135_s9, %s135_s9, %s136_s10  }
  0x3e   :  { %132 = dma.done.wait [#allocation4], 256  }
  0x3f   :  { %133 = vsyncadd [#allocation4], 4294967040 }
  0x40   :  { %74 = vsyncpa [#allocation3], 1 }
  0x41   :  { %75 = vsyncpa [#allocation4], 1 }

</bundles_post_ra>
